<compile_context>
chip_gen: v6e
topology: v6e:2x2x1
jax: 0.10.0
libtpu: 0.0.40
codegen_flags: <defaults>
</compile_context>

<pallas_src>
import math
import functools

import jax
import jax.numpy as jnp
from jax.experimental import pallas as pl
from jax.experimental.pallas import tpu as pltpu


def _make_pe_table(max_len: int, dim: int) -> jnp.ndarray:
    """Deterministic sin/cos positional-encoding table, shape [max_len, dim] (float32)."""
    position = jnp.arange(0, max_len, dtype=jnp.float32)[:, None]             # [L, 1]
    div_term = jnp.exp(jnp.arange(0, dim, 2, dtype=jnp.float32)
                       * -(math.log(10000.0) / dim))                          # [D/2]
    pe = jnp.zeros((max_len, dim), dtype=jnp.float32)
    pe = pe.at[:, 0::2].set(jnp.sin(position * div_term))
    pe = pe.at[:, 1::2].set(jnp.cos(position * div_term))
    return pe


def _choose_tiling(rows: int, cap_rows: int):
    """Return (row_tile, padded_rows).

    Prefers an 8-aligned divisor of `rows` close to the byte-derived cap; if the best divisor
    is tiny (would leave us at the ~29%-of-roofline small-tile regime) we pad `rows` up to a
    multiple of a full-size tile instead (the wrapper slices the pad off afterwards).
    """
    if rows <= cap_rows:
        return rows, rows
    best = 0
    t = 8
    while t <= cap_rows:
        if rows % t == 0:
            best = t
        t += 8
    min_good = max(8, (cap_rows // 4) // 8 * 8)
    if best >= min_good:
        return best, rows
    tile = max(8, cap_rows // 8 * 8)
    padded = ((rows + tile - 1) // tile) * tile
    return tile, padded


def _pos_enc_kernel(seed_ref, emb_ref, pe_ref, out_ref, *,
                    scale, drop_thresh_u32, use_hw_prng):
    # emb_ref / out_ref: (TR, L) block (leading batch dim squeezed by BlockSpec).
    # pe_ref: matching (TR, L) float32 tile (pre-scaled by 1/(1-p) when dropout is on).
    x = emb_ref[...].astype(jnp.float32) * jnp.float32(scale) + pe_ref[...]

    if drop_thresh_u32 is not None:
        shape = x.shape
        flat_block = pl.program_id(0) * pl.num_programs(1) + pl.program_id(1)
        if use_hw_prng:
            # Hardware PRNG: distinct stream per (seed, block).  Threshold compare only —
            # the whole dropout epilogue is ~2 VPU ops/elem instead of ~18.
            pltpu.prng_seed(seed_ref[0], flat_block)
            gr = ((shape[0] + 7) // 8) * 8
            gc = ((shape[1] + 127) // 128) * 128
            bits = pltpu.prng_random_bits((gr, gc))
            if bits.dtype != jnp.uint32:
                bits = pltpu.bitcast(bits, jnp.uint32)
            bits = bits[:shape[0], :shape[1]]
        else:
            # Portable fallback (non-TPU backends / interpret mode): trimmed counter hash.
            salt = (seed_ref[0].astype(jnp.uint32)
                    + jnp.uint32(0x9E3779B9) * (flat_block.astype(jnp.uint32) + jnp.uint32(1)))
            r = jax.lax.broadcasted_iota(jnp.int32, (shape[0], 1), 0).astype(jnp.uint32)
            c = jax.lax.broadcasted_iota(jnp.int32, (1, shape[1]), 1).astype(jnp.uint32)
            h = r * jnp.uint32(0x01000193) + c * jnp.uint32(0x0343FD) + salt
            h = h ^ (h >> 16)
            h = h * jnp.uint32(0x7FEB352D)
            h = h ^ (h >> 15)
            h = h * jnp.uint32(0x846CA68B)
            h = h ^ (h >> 16)
            bits = h
        keep = bits >= jnp.uint32(drop_thresh_u32)          # P(keep) = 1 - p
        x = jnp.where(keep, x, jnp.float32(0.0))

    out_ref[...] = x.astype(out_ref.dtype)


def positional_encoding_forward(emb, pe_table, *, dim, dropout_p, seed=0, step=None,
                                block_bytes_cap=2 << 20):
    """emb: [B, S, D]. Returns [B, S, D] in emb.dtype."""
    B, S, D = emb.shape
    assert D == dim
    p = float(dropout_p)

    if p >= 1.0:
        # nn.Dropout(p=1) in training zeroes everything (avoid 1/(1-p) = inf).
        return jnp.zeros_like(emb)

    inv_keep = 1.0 / (1.0 - p) if p > 0.0 else 1.0
    scale = math.sqrt(dim) * inv_keep                # fold inv_keep into the emb scale

    # PE slab, float32 end to end (resident across the inner batch loop -> negligible bytes,
    # and avoids bf16 double-rounding of the table).
    if step:  # mirrors PyTorch's `if step:` truthiness (step=0 falls through to the table path)
        pe_row = jax.lax.dynamic_slice_in_dim(pe_table, step, 1, axis=0)[0]     # (D,)
        pe_slab = jnp.broadcast_to(pe_row[None, :], (S, D)).astype(jnp.float32)  # (S, D)
    else:
        pe_slab = pe_table[:S].astype(jnp.float32)                               # (S, D)
    if p > 0.0:
        pe_slab = pe_slab * jnp.float32(inv_keep)    # pre-scale once; O(S*D), amortized over B

    # Lane-dense flattening: (S, D) -> (S*D/128, 128) so stores are unmasked vst
    # (applies to both the table and the step path).
    if D % 128 != 0 and (S * D) % 128 == 0:
        lanes = 128
        rows = (S * D) // 128
        x = emb.reshape(B, rows, lanes)
        pe_slab = pe_slab.reshape(rows, lanes)
    else:
        rows, lanes = S, D
        x = emb

    # Byte-based row-tile cap: ~2 MiB emb block regardless of dtype (bf16 gets full tiles),
    # bounded so 2x double-buffered in + out + resident PE fits v7x's 64 MiB VMEM easily.
    cap_rows = max(8, (block_bytes_cap // max(lanes * emb.dtype.itemsize, 1)) // 8 * 8)
    tr, rows_padded = _choose_tiling(rows, cap_rows)
    if rows_padded != rows:
        x = jnp.pad(x, ((0, 0), (0, rows_padded - rows), (0, 0)))
        pe_slab = jnp.pad(pe_slab, ((0, rows_padded - rows), (0, 0)))
    num_row_tiles = rows_padded // tr

    if p > 0.0:
        drop_thresh = min(int(round(p * 4294967296.0)), 0xFFFFFFFF)   # uint32 threshold
    else:
        drop_thresh = None

    use_hw_prng = (jax.default_backend() == "tpu")

    kernel = functools.partial(_pos_enc_kernel, scale=scale,
                               drop_thresh_u32=drop_thresh, use_hw_prng=use_hw_prng)

    seed_arr = jnp.asarray([seed], dtype=jnp.int32)

    # Grid layout:
    #   * normal case: (row_tiles, B) with batch inner so the PE tile stays resident across B;
    #   * single-row-tile case (short seq / decode): (B, 1) so the leading "parallel" axis has
    #     >= 2 iterations and both v7x TensorCores stay busy (PE index is (0,0) either way).
    if num_row_tiles >= 2:
        grid = (num_row_tiles, B)
        io_spec = pl.BlockSpec((None, tr, lanes), lambda t, b, s: (b, t, 0))
        pe_spec = pl.BlockSpec((tr, lanes), lambda t, b, s: (t, 0))
    else:
        grid = (B, num_row_tiles)
        io_spec = pl.BlockSpec((None, tr, lanes), lambda b, t, s: (b, t, 0))
        pe_spec = pl.BlockSpec((tr, lanes), lambda b, t, s: (t, 0))

    # VMEM budget: double-buffered emb in + out + double-buffered f32 PE + margin (no low clamp
    # that could silently under-provision; blocks are capped at ~2 MiB so this stays small).
    emb_block_bytes = tr * lanes * emb.dtype.itemsize
    pe_block_bytes = tr * lanes * 4
    vmem_limit = int(max(4 * emb_block_bytes + 2 * pe_block_bytes + (4 << 20), 16 << 20))

    out = pl.pallas_call(
        kernel,
        out_shape=jax.ShapeDtypeStruct((B, rows_padded, lanes), emb.dtype),
        grid_spec=pltpu.PrefetchScalarGridSpec(
            num_scalar_prefetch=1,
            grid=grid,
            in_specs=[io_spec, pe_spec],
            out_specs=io_spec,
        ),
        compiler_params=pltpu.CompilerParams(
            dimension_semantics=("parallel", "parallel"),
            vmem_limit_bytes=vmem_limit,
        ),
    )(seed_arr, x, pe_slab)

    if rows_padded != rows:
        out = out[:, :rows, :]
    if out.shape != (B, S, D):
        out = out.reshape(B, S, D)
    return out


if __name__ == "__main__":
    # Small, deterministic example: batch=2, seq=8, dim=32.
    B, S, D = 2, 8, 32
    MAX_LEN = 64
    DROPOUT_P = 0.1

    key = jax.random.PRNGKey(0)
    emb = jax.random.normal(key, (B, S, D), dtype=jnp.float32)
    pe_table = _make_pe_table(MAX_LEN, D)

    # 1) No-dropout path (p=0) — exercises the lane-dense flattened layout (D=32 < 128).
    out_nodrop = positional_encoding_forward(emb, pe_table, dim=D, dropout_p=0.0)
    out_nodrop = jax.block_until_ready(out_nodrop)
    ref = emb * math.sqrt(D) + pe_table[:S][None, :, :]
    assert jnp.allclose(out_nodrop, ref, atol=1e-5), "mismatch vs reference (no dropout)"

    # 2) Training-mode dropout (p=0.1): every output element must be either 0 or ref/(1-p).
    out_drop = positional_encoding_forward(emb, pe_table, dim=D, dropout_p=DROPOUT_P, seed=42)
    out_drop = jax.block_until_ready(out_drop)
    assert out_drop.shape == (B, S, D)
    scaled_ref = ref / (1.0 - DROPOUT_P)
    is_dropped = jnp.abs(out_drop) <= 1e-6
    is_kept = jnp.abs(out_drop - scaled_ref) <= 1e-4 * (1.0 + jnp.abs(scaled_ref))
    assert bool(jnp.all(is_dropped | is_kept)), "dropout output not consistent with mask model"
    frac_zero = float(jnp.mean((out_drop == 0).astype(jnp.float32)))
    assert 0.0 < frac_zero < 0.4, f"dropout rate looks wrong: {frac_zero}"

    # 3) step != None path (decode-style): add pe[step] to every position; PE row is pre-tiled
    #    into the same lane-dense layout as the table path (no masked stores).
    out_step = positional_encoding_forward(emb, pe_table, dim=D, dropout_p=0.0, step=3)
    out_step = jax.block_until_ready(out_step)
    ref_step = emb * math.sqrt(D) + pe_table[3][None, None, :]
    assert jnp.allclose(out_step, ref_step, atol=1e-5), "mismatch vs reference (step path)"

    # 4) bf16 I/O path (half the HBM traffic; math still f32 inside the kernel, PE stays f32).
    emb_bf16 = emb.astype(jnp.bfloat16)
    out_bf16 = positional_encoding_forward(emb_bf16, pe_table, dim=D, dropout_p=0.0)
    out_bf16 = jax.block_until_ready(out_bf16)
    assert out_bf16.dtype == jnp.bfloat16
    assert jnp.allclose(out_bf16.astype(jnp.float32), ref, atol=0.25, rtol=0.05), \
        "mismatch vs reference (bf16 path)"

    # 5) bf16 + dropout (the path the review flagged as VALU-bound with the hash PRNG).
    out_bf16_drop = positional_encoding_forward(emb_bf16, pe_table, dim=D,
                                                dropout_p=DROPOUT_P, seed=7)
    out_bf16_drop = jax.block_until_ready(out_bf16_drop)
    assert out_bf16_drop.dtype == jnp.bfloat16
    frac_zero_bf16 = float(jnp.mean((out_bf16_drop == 0).astype(jnp.float32)))
    assert 0.0 < frac_zero_bf16 < 0.4, f"bf16 dropout rate looks wrong: {frac_zero_bf16}"

    print("KERNEL_OK")
</pallas_src>

<mosaic_0001>
module attributes {stable_mosaic.version = 11 : i64} {
  func.func @_pos_enc_kernel(%arg0: i32, %arg1: i32, %arg2: memref<1xi32, #tpu.memory_space<smem>>, %arg3: memref<1x2x128xf32, #tpu.memory_space<vmem>>, %arg4: memref<2x128xf32, #tpu.memory_space<vmem>>, %arg5: memref<1x2x128xf32, #tpu.memory_space<vmem>>) attributes {dimension_semantics = [#tpu.dimension_semantics<parallel>, #tpu.dimension_semantics<parallel>], iteration_bounds = array<i64: 2, 1>, scalar_prefetch = 1 : i64, scratch_operands = 0 : i64, tpu.core_type = #tpu.core_type<tc>, window_params = [{transform_indices = @transform_0, window_bounds = array<i64: 1, 2, 128>}, {transform_indices = @transform_1, window_bounds = array<i64: 2, 128>}, {transform_indices = @transform_2, window_bounds = array<i64: 1, 2, 128>}]} {
    %c0 = arith.constant 0 : index
    %c0_0 = arith.constant 0 : index
    %c0_1 = arith.constant 0 : index
    %0 = vector.load %arg3[%c0, %c0_0, %c0_1] : memref<1x2x128xf32, #tpu.memory_space<vmem>>, vector<1x2x128xf32>
    %1 = vector.shape_cast %0 : vector<1x2x128xf32> to vector<2x128xf32>
    %cst = arith.constant 5.65685415 : f32
    %2 = vector.broadcast %cst : f32 to vector<2x128xf32>
    %3 = arith.mulf %1, %2 : vector<2x128xf32>
    %c0_2 = arith.constant 0 : index
    %c0_3 = arith.constant 0 : index
    %4 = vector.load %arg4[%c0_2, %c0_3] : memref<2x128xf32, #tpu.memory_space<vmem>>, vector<2x128xf32>
    %5 = arith.addf %3, %4 : vector<2x128xf32>
    %c0_4 = arith.constant 0 : index
    %c0_5 = arith.constant 0 : index
    %c0_6 = arith.constant 0 : index
    %6 = vector.load %arg5[%c0_4, %c0_5, %c0_6] : memref<1x2x128xf32, #tpu.memory_space<vmem>>, vector<1x2x128xf32>
    %7 = vector.shape_cast %6 : vector<1x2x128xf32> to vector<2x128xf32>
    %8 = vector.shape_cast %5 : vector<2x128xf32> to vector<1x2x128xf32>
    tpu.vector_store %arg5[%c0_4, %c0_5, %c0_6], %8 {strides = array<i32>} : memref<1x2x128xf32, #tpu.memory_space<vmem>>, vector<1x2x128xf32>,
    return
  }
  func.func @transform_0(%arg0: i32, %arg1: i32, %arg2: memref<1xi32, #tpu.memory_space<smem>>) -> (i32, i32, i32) {
    %c0_i32 = arith.constant 0 : i32
    %c0_i32_0 = arith.constant 0 : i32
    return %arg0, %arg1, %c0_i32 : i32, i32, i32
  }
  func.func @transform_1(%arg0: i32, %arg1: i32, %arg2: memref<1xi32, #tpu.memory_space<smem>>) -> (i32, i32) {
    %c0_i32 = arith.constant 0 : i32
    %c0_i32_0 = arith.constant 0 : i32
    return %arg1, %c0_i32 : i32, i32
  }
  func.func @transform_2(%arg0: i32, %arg1: i32, %arg2: memref<1xi32, #tpu.memory_space<smem>>) -> (i32, i32, i32) {
    %c0_i32 = arith.constant 0 : i32
    %c0_i32_0 = arith.constant 0 : i32
    return %arg0, %arg1, %c0_i32 : i32, i32, i32
  }
}

</mosaic_0001>

<bundles_post_ra>
// kernel: tpu_custom_call.1
= control target key start
LH: loop header
LB: loop body
LE: loop exit
PB: predicated region body
PF: predicated region fallthrough
CT: control target
= control target key end

     0   :  { %9 = vsyncpa [#allocation5], 0  ;;  %s655_s0 = inlined_call_operand.<no memory space> [shape: s32[1], index: 0, kind: input, shape index: {}]   ;;  %s656_s1 = inlined_call_operand.hbm [shape: f32[2,2,128], index: 1, kind: input, shape index: {}]   ;;  %s657_s2 = inlined_call_operand.vmem [shape: f32[2,128], index: 2, kind: input, shape index: {}]   ;;  %s658_s3 = inlined_call_operand.hbm [shape: f32[2,2,128], index: 3, kind: output, shape index: {}]  }
   0x1   :  { %11 = vsyncpa [#allocation5 + $0x1], 0 }
   0x2   :  { %12 = vsyncpa [#allocation6], 0 }
   0x3   :  { %14 = vsyncpa [#allocation6 + $0x1], 0  ;;  %s518_s12 = smov 0   ;;  %s520_s13 = smov 0  }
   0x4   :  { %s522_s14 = smov 0   ;;  %s524_s0 = smov 0  }
   0x5   :  { %s526_s15 = smov 0   ;;  %s528_s16 = smov 0  }
   0x6 LB: > { %s310_s17 = sadd.s32 4294967295, %s494_s16   ;;  %s311_s18 = sadd.s32 4294967294, %s494_s16   ;;  %s494_s16 = sphi %s528_s16, %s20_s16   ;;  %s490_s15 = sphi %s526_s15, %s670_s15   ;;  %s486_s0 = sphi %s524_s0, %s669_s0   ;;  %s482_s14 = sphi %s522_s14, %s668_s14   ;;  %s478_s13 = sphi %s520_s13, %s667_s13   ;;  %s474_s12 = sphi %s518_s12, %s666_s12  }
   0x7   : > { %s32_s19 = sadd.s32 1, %s490_s15  ;;  %s41_s20 = sadd.s32 1, %s482_s14 }
   0x8   : > { %p34_p0 = scmp.ge.s32.totalorder %s32_s19, 2  ;;  %p48_p1 = scmp.ne.s32.totalorder %s482_s14, %s478_s13 }
   0x9   : > { %p49_p2 = scmp.eq.s32.totalorder %s494_s16, 0  ;;  %p54_p3 = scmp.ne.s32.totalorder %s478_s13, %s474_s12 }
   0xa   : > { %s672_s19 = smov (%p34_p0, %s32_s19), 0  ;;  %p55_p5 = scmp.eq.s32.totalorder %s310_s17, 0 }
   0xb   : > { %p559_p4 = por %p49_p2, %p48_p1  ;;  %s36_s22 = ssub.s32 %s490_s15, %s672_s19 }
   0xc   : > { %p106_p6 = scmp.eq.s32.totalorder %s310_s17, 1  ;;  %p39_p7 = scmp.eq.s32.totalorder %s36_s22, 0 }
   0xd   : > { %p565_p8 = por %p55_p5, %p54_p3  ;;  %p112_p10 = scmp.eq.s32.totalorder %s311_s18, 1 }
   0xe   : > { %p569_p9 = por %p106_p6, %p48_p1  ;;  %p336_p13 = scmp.lt.s32.totalorder %s494_s16, 2 }
   0xf   : > { %s574_s25 = scalar_select %p39_p7, %s482_s14, %s41_s20  }
  0x10   : > { %p576_p11 = por %p112_p10, %p54_p3  ;;  %s139_s27 = sand.u32 1, %s482_s14  }
  0x11   : > { %s315_s28 = sshll.u32 %s139_s27, 1  ;;  %s316_s29 = sshll.u32 %s490_s15, 5 }
  0x12   : > { %s662_s26 = scalar_select %p576_p11, 1, 0 }
  0x13   : > { %s149_s5 = scalar_lea.hbm %s656_s1, %s316_s29  ;;  %s143_s6 = scalar_lea.vmem [#allocation4], %s315_s28 }
  0x14   : > { %s151_s7 = sshll.u32 %s143_s6, 4  ;;  %p589_p0 = pnand %p336_p13, %p559_p4  ;;  %s152_s7 = int_to_ptr.vmem [resolvable:$true] %s151_s7 }
  0x15   : > { %p317_p1 = scmp.ge.s32.totalorder %s494_s16, 1  ;;  %p156_p2 = scmp.lt.s32.totalorder %s494_s16, 3 }
  0x16   : > { %s140_s9 = scalar_lea.sflag [#allocation5], %s139_s27  ;;  %p388_p3 = pneg %p589_p0 }
  0x17   : > { %s399_s10 = scalar_lea.vmem %s152_s7, 32  ;;  %s496_s11 = smov [#allocation4]  }
  0x18   : > { %p400_p5 = scmp.ne.s32.totalorder %s152_s7, %s399_s10  ;;  %s404_s17 = sshll.u32 %s496_s11, 4  ;;  %s405_s17 = int_to_ptr.vmem [resolvable:$false] %s404_s17 }
  0x19   : > { %s406_s18 = scalar_lea.vmem %s405_s17, 64  ;;  %p407_p10 = scmp.lt.s32.totalorder %s152_s7, %s405_s17 }
  0x1a   : > { %p402_p6 = pnand %p400_p5, %p388_p3  ;;  %p408_p12 = scmp.lt.s32.totalorder %s406_s18, %s399_s10 }
  0x1c   : > { %p403_p7 = pneg %p402_p6  ;;  %p409_p4 = por %p408_p12, %p407_p10 }
  0x1e   : > { %p410_p13 = pnand %p409_p4, %p403_p7 }
  0x20   : > { %413 = shalt.err (!%p410_p13)
}
  0x21   : > { %331 = dma.hbm_to_vmem [thread:$0]  (!%p589_p0), %s149_s5, 32, %s152_s7, %s140_s9  }
  0x22   : > { %p157_p11 = pnand %p317_p1, %p156_p2 }
  0x23   : > { %s604_s20 = sand.u32 (!%p157_p11), 1, %s478_s13  }
  0x24   : > { %160 = sbr.rel (%p157_p11) target bundleno = 66 (0x42), region = 28  ;;  %s318_s21 = sshll.u32 (!%p157_p11), %s604_s20, 1 }
  0x25   : > { %s163_s22 = scalar_lea.sflag (!%p157_p11), [#allocation5], %s604_s20  ;;  %s166_s27 = scalar_lea.vmem (!%p157_p11), [#allocation4], %s318_s21 }
  0x29   : > { %465 = dma.done.wait (%p565_p8), %s163_s22, 32  }
  0x2a   : > { %467 = vsyncadd (%p565_p8), %s163_s22, 4294967264  ;;  %v195_v0 = vld [vmem:[%s166_s27] sm:$0x3]  ;;  %s190_s30 = scalar_lea.vmem [#allocation7], %s318_s21  ;;  %s321_s5 = sshll.u32 %s486_s0, 5 }
  0x2b   : > { %v197_v1 = vld [vmem:[%s657_s2] sm:$0x3]  ;;  %s215_s4 = sshll.u32 %s190_s30, 4  ;;  %v196_v2 = vmul.f32 5.656854, %v195_v0  ;;  %s213_s8 = scalar_lea.hbm %s658_s3, %s321_s5  ;;  %s216_s4 = int_to_ptr.vmem [resolvable:$true] %s215_s4 }
  0x2c   : > { %s201_s23 = scalar_lea.sflag [#allocation6], %s604_s20  ;;  %s414_s9 = scalar_lea.vmem %s216_s4, 32 }
  0x2d   : > { %v198_v3 = vadd.f32 %v197_v1, %v196_v2  ;;  %p415_p8 = scmp.ne.s32.totalorder %s216_s4, %s414_s9  ;;  %s497_s10 = smov [#allocation7]  }
  0x2e   : > { %s418_s11 = sshll.u32 %s497_s10, 4  ;;  %s419_s11 = int_to_ptr.vmem [resolvable:$false] %s418_s11 }
  0x2f   : > { %199 = vst [vmem:[%s190_s30] sm:$0x3] %v198_v3  ;;  %p416_p11 = pnand %p415_p8, %p569_p9  ;;  %s420_s17 = scalar_lea.vmem %s419_s11, 64 }
  0x30   : > { %p421_p0 = scmp.lt.s32.totalorder %s216_s4, %s419_s11  ;;  %p422_p1 = scmp.lt.s32.totalorder %s420_s17, %s414_s9 }
  0x31   : > { %p417_p12 = pneg %p416_p11 }
  0x32   : > { %p423_p2 = por %p422_p1, %p421_p0 }
  0x34   : > { %p424_p3 = pnand %p423_p2, %p417_p12 }
  0x36   : > { %427 = shalt.err (!%p424_p3)
}
  0x37   : > { %s428_s0 = scalar_lea.hbm %s213_s8, 32  ;;  %s432_s21 = scalar_lea.hbm %s658_s3, 64 }
  0x38   : > { %p429_p5 = scmp.ne.s32.totalorder %s213_s8, %s428_s0  ;;  %p433_p10 = scmp.lt.s32.totalorder %s213_s8, %s658_s3 }
  0x39   : > { %p434_p4 = scmp.lt.s32.totalorder %s432_s21, %s428_s0 }
  0x3a   : > { %p430_p6 = pnand %p429_p5, %p569_p9 }
  0x3b   : > { %p435_p13 = por %p434_p4, %p433_p10 }
  0x3c   : > { %p431_p7 = pneg %p430_p6 }
  0x3e   : > { %p436_p8 = pnand %p435_p13, %p431_p7 }
  0x40   : > { %439 = shalt.err (!%p436_p8)
}
  0x41   : > { %326 = dma.vmem_to_hbm [thread:$0]  (%p569_p9), %s216_s4, 32, %s213_s8, %s201_s23  }
  0x42 PF: > { %s227_s28 = sand.u32 1, %s474_s12   ;;  %p664_p11 = scmp.ne.s32.totalorder %s662_s26, 0 }
  0x43   : > { %p665_p12 = scmp.ge.s32.totalorder %s494_s16, 2  ;;  %s228_s29 = scalar_lea.sflag [#allocation6], %s227_s28 }
  0x45   : > { %p333_p0 = pnand %p665_p12, %p664_p11 }
  0x47   : > { %p334_p1 = pneg %p333_p0 }
  0x49   : > { %469 = dma.done.wait (%p334_p1), %s228_s29, 32  }
  0x4a   : > { %471 = vsyncadd (%p334_p1), %s228_s29, 4294967264  ;;  %s20_s16 = sadd.s32 1, %s494_s16   ;;  %s666_s12 = smov %s478_s13 }
  0x4b   : > { %p17_p2 = scmp.ge.s32.totalorder %s20_s16, 4   ;;  %s667_s13 = smov %s482_s14 }
  0x4c   : > { %s668_s14 = smov %s574_s25  ;;  %s669_s0 = smov %s490_s15 }
  0x4d   : > { %s670_s15 = smov %s672_s19  ;;  %19 = sbr.rel (!%p17_p2) target bundleno = 6 (0x6), region = 76 }
  0x52   :  { %233 = vsyncpa [#allocation5], 1 }
  0x53   :  { %235 = vsyncpa [#allocation5 + $0x1], 1 }
  0x54   :  { %236 = vsyncpa [#allocation6], 1 }
  0x55   :  { %238 = vsyncpa [#allocation6 + $0x1], 1 }

</bundles_post_ra>
